<compile_context>
chip_gen: v6e
topology: v6e:2x2x1
jax: 0.10.0
libtpu: 0.0.40
codegen_flags: <defaults>
</compile_context>

<pallas_src>
import jax
import jax.numpy as jnp
from jax import lax
from jax.experimental import pallas as pl
from jax.experimental.pallas import tpu as pltpu

INPUT_SIZE = 2
HIDDEN_SIZE = 10
OUTPUT_SIZE = 2
LANE = 128

# Packed fp32 parameter slab (PACK_ROWS, 128). All row starts are 8-aligned so each sliced
# weight/bias block sits inside aligned (8,128) sublane tiles (no straddling shuffles).
ROW_W1 = 0    # rows  0..9   fc1.weight (10, 2)
ROW_B1 = 16   # rows 16..25  fc1.bias   (10, 1)
ROW_W2 = 32   # rows 32..41  fc2.weight (10, 10)
ROW_B2 = 48   # rows 48..57  fc2.bias   (10, 1)
ROW_W3 = 64   # rows 64..65  fc3.weight (2, 10)
ROW_B3 = 72   # rows 72..73  fc3.bias   (2, 1)
PACK_ROWS = 80
PACK_COLS = LANE

_HIGH = lax.Precision.HIGHEST  # full-fp32 MXU contraction (no bf16 truncation)


def mlp_logsoftmax_kernel(p_ref, x_ref, o_ref):
    # x tile: (INPUT_SIZE, TB) fp32, batch on lanes.
    x = x_ref[...]

    # Static slices of the resident parameter slab (cheap sub-tile vector loads, 8-aligned rows).
    w1 = p_ref[ROW_W1:ROW_W1 + HIDDEN_SIZE, :INPUT_SIZE]    # (10, 2)
    b1 = p_ref[ROW_B1:ROW_B1 + HIDDEN_SIZE, :1]             # (10, 1)
    w2 = p_ref[ROW_W2:ROW_W2 + HIDDEN_SIZE, :HIDDEN_SIZE]   # (10, 10)
    b2 = p_ref[ROW_B2:ROW_B2 + HIDDEN_SIZE, :1]             # (10, 1)
    w3 = p_ref[ROW_W3:ROW_W3 + OUTPUT_SIZE, :HIDDEN_SIZE]   # (2, 10)
    b3 = p_ref[ROW_B3:ROW_B3 + OUTPUT_SIZE, :1]             # (2, 1)

    # fc1 / fc2 / fc3 on the MXU (fp32); bias columns broadcast along lanes; relu on the VPU.
    h1 = jnp.maximum(
        jnp.dot(w1, x, precision=_HIGH, preferred_element_type=jnp.float32) + b1, 0.0)   # (10, TB)
    h2 = jnp.maximum(
        jnp.dot(w2, h1, precision=_HIGH, preferred_element_type=jnp.float32) + b2, 0.0)  # (10, TB)
    z = jnp.dot(w3, h2, precision=_HIGH, preferred_element_type=jnp.float32) + b3        # (2, TB)

    # log_softmax over the 2 classes == between the two sublane rows (VPU + EUP only).
    z0 = z[0:1, :]
    z1 = z[1:2, :]
    m = jnp.maximum(z0, z1)
    lse = m + jnp.log(jnp.exp(z0 - m) + jnp.exp(z1 - m))
    o_ref[...] = z - lse                                     # (2, TB) lane-dense store


def pack_params(params):
    """Pack (w1,b1,w2,b2,w3,b3) in PyTorch conventions into one (80,128) fp32 slab (done once)."""
    w1, b1, w2, b2, w3, b3 = params
    slab = jnp.zeros((PACK_ROWS, PACK_COLS), jnp.float32)
    slab = slab.at[ROW_W1:ROW_W1 + HIDDEN_SIZE, :INPUT_SIZE].set(w1)
    slab = slab.at[ROW_B1:ROW_B1 + HIDDEN_SIZE, 0].set(b1)
    slab = slab.at[ROW_W2:ROW_W2 + HIDDEN_SIZE, :HIDDEN_SIZE].set(w2)
    slab = slab.at[ROW_B2:ROW_B2 + HIDDEN_SIZE, 0].set(b2)
    slab = slab.at[ROW_W3:ROW_W3 + OUTPUT_SIZE, :HIDDEN_SIZE].set(w3)
    slab = slab.at[ROW_B3:ROW_B3 + OUTPUT_SIZE, 0].set(b3)
    return slab


def _round_up(n, m):
    return (n + m - 1) // m * m


def net_forward(x, packed_params, *, block_b=2048):
    """Forward pass: x (B, INPUT_SIZE) -> (B, OUTPUT_SIZE) log-probabilities."""
    B = x.shape[0]
    x_t = jnp.transpose(x).astype(jnp.float32)           # (INPUT_SIZE, B), batch-on-lanes

    # Lane-dense tile: multiple of 128; small B collapses to a single padded tile / grid step.
    tb = min(_round_up(block_b, LANE), _round_up(B, LANE))
    b_pad = _round_up(B, tb)
    if b_pad != B:
        x_t = jnp.pad(x_t, ((0, 0), (0, b_pad - B)))      # padded columns computed then dropped
    num_tiles = b_pad // tb
    # VMEM budget: (8 x tb x 4 B) per double-buffered x/out block + 40 KiB resident slab —
    # well under every chip's scoped limit for tb <= 8192; sweep block_b upward for huge B.

    out_t = pl.pallas_call(
        mlp_logsoftmax_kernel,
        out_shape=jax.ShapeDtypeStruct((OUTPUT_SIZE, b_pad), jnp.float32),
        grid_spec=pltpu.PrefetchScalarGridSpec(
            num_scalar_prefetch=0,
            grid=(num_tiles,),
            in_specs=[
                pl.BlockSpec((PACK_ROWS, PACK_COLS), lambda i: (0, 0)),  # resident weight slab
                pl.BlockSpec((INPUT_SIZE, tb), lambda i: (0, i)),        # x batch tile
            ],
            out_specs=pl.BlockSpec((OUTPUT_SIZE, tb), lambda i: (0, i)),
        ),
        compiler_params=pltpu.CompilerParams(
            dimension_semantics=("parallel",),            # v7x: 2 TensorCores split the tiles
        ),
    )(packed_params, x_t)

    return jnp.transpose(out_t[:, :B])                    # back to (B, OUTPUT_SIZE)


def init_params(key):
    """torch.nn.Linear-style init: weight (out,in), bias (out,), U[-1/sqrt(fan_in), 1/sqrt(fan_in)]."""
    ks = jax.random.split(key, 6)

    def lin(kw, kb, fan_in, fan_out):
        bound = 1.0 / jnp.sqrt(jnp.float32(fan_in))
        w = jax.random.uniform(kw, (fan_out, fan_in), jnp.float32, -bound, bound)
        b = jax.random.uniform(kb, (fan_out,), jnp.float32, -bound, bound)
        return w, b

    w1, b1 = lin(ks[0], ks[1], INPUT_SIZE, HIDDEN_SIZE)
    w2, b2 = lin(ks[2], ks[3], HIDDEN_SIZE, HIDDEN_SIZE)
    w3, b3 = lin(ks[4], ks[5], HIDDEN_SIZE, OUTPUT_SIZE)
    return (w1, b1, w2, b2, w3, b3)


def reference_forward(x, params):
    """Pure-JAX reference mirroring the PyTorch module (fp32, full-precision dots)."""
    w1, b1, w2, b2, w3, b3 = params
    h1 = jnp.maximum(jnp.dot(x, w1.T, precision=_HIGH) + b1, 0.0)
    h2 = jnp.maximum(jnp.dot(h1, w2.T, precision=_HIGH) + b2, 0.0)
    z = jnp.dot(h2, w3.T, precision=_HIGH) + b3
    return jax.nn.log_softmax(z, axis=1)


if __name__ == "__main__":
    key = jax.random.PRNGKey(0)
    k_params, k_x1, k_x2 = jax.random.split(key, 3)

    params = init_params(k_params)
    packed = jax.block_until_ready(pack_params(params))   # packed once, reused across calls

    # Small batch: single grid step (tile padded to 128 lanes).
    x_small = jax.random.normal(k_x1, (8, INPUT_SIZE), jnp.float32)
    out_small = jax.block_until_ready(net_forward(x_small, packed))
    ref_small = reference_forward(x_small, params)
    assert out_small.shape == (8, OUTPUT_SIZE)
    assert jnp.allclose(out_small, ref_small, atol=1e-4, rtol=1e-4), "mismatch vs reference (B=8)"

    # Non-multiple batch with a small tile: exercises the multi-step grid + lane padding path.
    x_big = jax.random.normal(k_x2, (300, INPUT_SIZE), jnp.float32)
    out_big = jax.block_until_ready(net_forward(x_big, packed, block_b=128))
    ref_big = reference_forward(x_big, params)
    assert out_big.shape == (300, OUTPUT_SIZE)
    assert jnp.allclose(out_big, ref_big, atol=1e-4, rtol=1e-4), "mismatch vs reference (B=300)"

    print("KERNEL_OK")
</pallas_src>

<mosaic_0001>
module attributes {stable_mosaic.version = 11 : i64} {
  func.func @mlp_logsoftmax_kernel(%arg0: i32, %arg1: memref<80x128xf32, #tpu.memory_space<vmem>>, %arg2: memref<2x128xf32, #tpu.memory_space<vmem>>, %arg3: memref<2x128xf32, #tpu.memory_space<vmem>>) attributes {dimension_semantics = [#tpu.dimension_semantics<parallel>], iteration_bounds = array<i64: 1>, scalar_prefetch = 0 : i64, scratch_operands = 0 : i64, tpu.core_type = #tpu.core_type<tc>, window_params = [{pipeline_mode = #tpu.pipeline_mode<synchronous>, transform_indices = @transform_0, window_bounds = array<i64: 80, 128>}, {transform_indices = @transform_1, window_bounds = array<i64: 2, 128>}, {transform_indices = @transform_2, window_bounds = array<i64: 2, 128>}]} {
    %c0 = arith.constant 0 : index
    %c0_0 = arith.constant 0 : index
    %0 = vector.load %arg2[%c0, %c0_0] : memref<2x128xf32, #tpu.memory_space<vmem>>, vector<2x128xf32>
    %c0_1 = arith.constant 0 : index
    %c0_2 = arith.constant 0 : index
    %1 = vector.load %arg1[%c0_1, %c0_2] : memref<80x128xf32, #tpu.memory_space<vmem>>, vector<10x2xf32>
    %c16 = arith.constant 16 : index
    %c0_3 = arith.constant 0 : index
    %2 = vector.load %arg1[%c16, %c0_3] : memref<80x128xf32, #tpu.memory_space<vmem>>, vector<10x1xf32>
    %c32 = arith.constant 32 : index
    %c0_4 = arith.constant 0 : index
    %3 = vector.load %arg1[%c32, %c0_4] : memref<80x128xf32, #tpu.memory_space<vmem>>, vector<10x10xf32>
    %c48 = arith.constant 48 : index
    %c0_5 = arith.constant 0 : index
    %4 = vector.load %arg1[%c48, %c0_5] : memref<80x128xf32, #tpu.memory_space<vmem>>, vector<10x1xf32>
    %c64 = arith.constant 64 : index
    %c0_6 = arith.constant 0 : index
    %5 = vector.load %arg1[%c64, %c0_6] : memref<80x128xf32, #tpu.memory_space<vmem>>, vector<2x10xf32>
    %c72 = arith.constant 72 : index
    %c0_7 = arith.constant 0 : index
    %6 = vector.load %arg1[%c72, %c0_7] : memref<80x128xf32, #tpu.memory_space<vmem>>, vector<2x1xf32>
    %cst = arith.constant dense<0.000000e+00> : vector<10x128xf32>
    %7 = tpu.matmul %1, %0, %cst {dimension_numbers = #tpu.dot_dimension_numbers<[1], [0], [0], [1], [0, 0, 1, 1], [], []>, precision = #tpu.contract_precision<fp32>} : vector<10x2xf32>, vector<2x128xf32>, vector<10x128xf32> -> vector<10x128xf32>
    %8 = vector.broadcast %2 : vector<10x1xf32> to vector<10x128xf32>
    %9 = arith.addf %7, %8 : vector<10x128xf32>
    %cst_8 = arith.constant 0.000000e+00 : f32
    %10 = vector.broadcast %cst_8 : f32 to vector<10x128xf32>
    %11 = arith.maximumf %9, %10 : vector<10x128xf32>
    %cst_9 = arith.constant dense<0.000000e+00> : vector<10x128xf32>
    %12 = tpu.matmul %3, %11, %cst_9 {dimension_numbers = #tpu.dot_dimension_numbers<[1], [0], [0], [1], [0, 0, 1, 1], [], []>, precision = #tpu.contract_precision<fp32>} : vector<10x10xf32>, vector<10x128xf32>, vector<10x128xf32> -> vector<10x128xf32>
    %13 = vector.broadcast %4 : vector<10x1xf32> to vector<10x128xf32>
    %14 = arith.addf %12, %13 : vector<10x128xf32>
    %cst_10 = arith.constant 0.000000e+00 : f32
    %15 = vector.broadcast %cst_10 : f32 to vector<10x128xf32>
    %16 = arith.maximumf %14, %15 : vector<10x128xf32>
    %cst_11 = arith.constant dense<0.000000e+00> : vector<2x128xf32>
    %17 = tpu.matmul %5, %16, %cst_11 {dimension_numbers = #tpu.dot_dimension_numbers<[1], [0], [0], [1], [0, 0, 1, 1], [], []>, precision = #tpu.contract_precision<fp32>} : vector<2x10xf32>, vector<10x128xf32>, vector<2x128xf32> -> vector<2x128xf32>
    %18 = vector.broadcast %6 : vector<2x1xf32> to vector<2x128xf32>
    %19 = arith.addf %17, %18 : vector<2x128xf32>
    %20 = vector.extract_strided_slice %19 {offsets = [0, 0], sizes = [1, 128], strides = [1, 1]} : vector<2x128xf32> to vector<1x128xf32>
    %21 = vector.extract_strided_slice %19 {offsets = [1, 0], sizes = [1, 128], strides = [1, 1]} : vector<2x128xf32> to vector<1x128xf32>
    %22 = arith.maximumf %20, %21 : vector<1x128xf32>
    %23 = arith.subf %20, %22 : vector<1x128xf32>
    %24 = math.exp %23 : vector<1x128xf32>
    %25 = arith.subf %21, %22 : vector<1x128xf32>
    %26 = math.exp %25 : vector<1x128xf32>
    %27 = arith.addf %24, %26 : vector<1x128xf32>
    %28 = math.log %27 : vector<1x128xf32>
    %29 = arith.addf %22, %28 : vector<1x128xf32>
    %30 = vector.broadcast %29 : vector<1x128xf32> to vector<2x128xf32>
    %31 = arith.subf %19, %30 : vector<2x128xf32>
    %c0_12 = arith.constant 0 : index
    %c0_13 = arith.constant 0 : index
    %32 = vector.load %arg3[%c0_12, %c0_13] : memref<2x128xf32, #tpu.memory_space<vmem>>, vector<2x128xf32>
    tpu.vector_store %arg3[%c0_12, %c0_13], %31 {strides = array<i32>} : memref<2x128xf32, #tpu.memory_space<vmem>>, vector<2x128xf32>,
    return
  }
  func.func @transform_0(%arg0: i32) -> (i32, i32) {
    %c0_i32 = arith.constant 0 : i32
    %c0_i32_0 = arith.constant 0 : i32
    %c0_i32_1 = arith.constant 0 : i32
    return %c0_i32, %c0_i32_0 : i32, i32
  }
  func.func @transform_1(%arg0: i32) -> (i32, i32) {
    %c0_i32 = arith.constant 0 : i32
    %c0_i32_0 = arith.constant 0 : i32
    return %c0_i32, %arg0 : i32, i32
  }
  func.func @transform_2(%arg0: i32) -> (i32, i32) {
    %c0_i32 = arith.constant 0 : i32
    %c0_i32_0 = arith.constant 0 : i32
    return %c0_i32, %arg0 : i32, i32
  }
}

</mosaic_0001>

<bundles_post_ra>
// kernel: tpu_custom_call.1
= control target key start
LH: loop header
LB: loop body
LE: loop exit
PB: predicated region body
PF: predicated region fallthrough
CT: control target
= control target key end

     0   :  { %7 = vsyncpa [#allocation3], 0  ;;  %s1942_s0 = inlined_call_operand.hbm [shape: f32[80,128], index: 0, kind: input, shape index: {}]   ;;  %s1943_s1 = inlined_call_operand.hbm [shape: f32[2,128], index: 1, kind: input, shape index: {}]   ;;  %s1944_s2 = inlined_call_operand.hbm [shape: f32[2,128], index: 2, kind: output, shape index: {}]  }
   0x1   :  { %8 = vsyncpa [#allocation6], 0 }
   0x2   :  { %9 = vsyncpa [#allocation4], 0  ;;  %s1853_s9 = smov [#allocation2]  }
   0x3   :  { %s15_s10 = sshll.u32 %s1853_s9, 4  ;;  %s16_s10 = int_to_ptr.vmem [resolvable:$true] %s15_s10 }
   0x4   :  { %s1795_s11 = scalar_lea.vmem %s16_s10, 1280  ;;  %p1800_p1 = scmp.lt.s32.totalorder %s16_s10, %s16_s10 }
   0x5   :  { %p1796_p0 = scmp.ne.s32.totalorder %s16_s10, %s1795_s11  ;;  %p1801_p2 = scmp.lt.s32.totalorder %s1795_s11, %s1795_s11 }
   0x7   :  { %p1802_p3 = por %p1801_p2, %p1800_p1 }
   0x9   :  { %p1803_p4 = pnand %p1802_p3, %p1796_p0 }
   0xb   :  { %1806 = shalt.err (!%p1803_p4)
}
   0xc   :  { %s1854_s12 = smov 128   ;;  %s1855_s13 = smov 8  }
   0xd   :  { %21 = dma.hbm_to_vmem [thread:$0]  %s1942_s0, 1280, %s16_s10, [#allocation3], %s1854_s12, %s1854_s12, %s1855_s13  }
   0xe   :  { %s1856_s16 = smov [#allocation5]  }
   0xf   :  { %s28_s17 = sshll.u32 %s1856_s16, 4  ;;  %s29_s17 = int_to_ptr.vmem [resolvable:$true] %s28_s17 }
  0x10   :  { %s1815_s18 = scalar_lea.vmem %s29_s17, 32  ;;  %p1820_p6 = scmp.lt.s32.totalorder %s29_s17, %s29_s17 }
  0x11   :  { %p1816_p5 = scmp.ne.s32.totalorder %s29_s17, %s1815_s18  ;;  %p1821_p7 = scmp.lt.s32.totalorder %s1815_s18, %s1815_s18 }
  0x13   :  { %p1822_p8 = por %p1821_p7, %p1820_p6 }
  0x15   :  { %p1823_p9 = pnand %p1822_p8, %p1816_p5 }
  0x17   :  { %1826 = shalt.err (!%p1823_p9)
}
  0x18   :  { %31 = dma.hbm_to_vmem [thread:$0]  %s1943_s1, 32, %s29_s17, [#allocation6]  }
  0x19   :  { %1847 = dma.done.wait [#allocation3], 1280  }
  0x1a   :  { %1848 = vsyncadd [#allocation3], 4294966016 }
  0x1b   :  { %1849 = dma.done.wait [#allocation6], 32  }
  0x1c   :  { %1850 = vsyncadd [#allocation6], 4294967264  ;;  %v1857_v0 = vmov 0   ;;  %vm66_vm0 = vcmask 1041408   ;;  %vm59_vm1 = vcmask 15360   ;;  %v39_v2 = vld [vmem:[#allocation2] sm:$0xff] }
  0x1d   :  { %1779 = vset.pattern.permute.xlu0 %v1857_v0  ;;  %1780 = vset.pattern.permute.xlu1 %v1857_v0  ;;  %v38_v1 = vld [vmem:[#allocation5] sm:$0x3]  ;;  %v40_v3 = vld [vmem:[#allocation2 + $0x8] sm:$0x3]  ;;  %v61_v5 = vsel %vm59_vm1, %v39_v2, 0  ;;  %v43_v25 = vld [vmem:[#allocation2 + $0x20] sm:$0xff] }
  0x1e   :  { %v68_v4 = vsel %vm66_vm0, %v38_v1, 0  ;;  %v64_v6 = vsel %vm59_vm1, %v40_v3, 0  ;;  %v42_v7 = vld [vmem:[#allocation2 + $0x18] sm:$0x3]  ;;  %v136_v9 = vand.u32 4294901760, %v61_v5  ;;  %v41_v11 = vld [vmem:[#allocation2 + $0x10] sm:$0xff] }
  0x1f   :  { %v101_v8 = vand.u32 4294901760, %v68_v4  ;;  %v146_v10 = vand.u32 4294901760, %v64_v6  ;;  %56 = vperm.xlu0 %1779, %v42_v7   ;;  %v48_v18 = vld [vmem:[#allocation2 + $0x48] sm:$0x3]  ;;  %vm571_vm2 = vcmask 80896   ;;  %v45_v33 = vld [vmem:[#allocation2 + $0x30] sm:$0xff] }
  0x20   :  { %v137_v12 = vsub.f32 %v61_v5, %v136_v9  ;;  %1664 = vmatprep.mubr.f32.mxu1 %v136_v9  ;;  %v573_v26 = vsel %vm571_vm2, %v43_v25, 0  ;;  %v46_v32 = vld [vmem:[#allocation2 + $0x38] sm:$0x3]  ;;  %v44_v35 = vld [vmem:[#allocation2 + $0x28] sm:$0x3]  ;;  %vm1859_vm3 = vmmov 0  }
  0x21   :  { %1657 = vmatprep.subr.mxu0 %v101_v8  ;;  %v188_v13 = vsub.f32 %v68_v4, %v101_v8  ;;  %v147_v14 = vsub.f32 %v64_v6, %v146_v10  ;;  %v1884_v27 = vand.u32 4294901760, %v573_v26  ;;  %568 = vperm.xlu1 %1780, %v46_v32   ;;  %v576_v36 = vsel %vm571_vm2, %v44_v35, 0  ;;  %s1860_s0 = smov [#allocation7]  }
  0x22   :  { %1658 = vmatpush3.msra.mxu0 %v101_v8  ;;  %v138_v15 = vand.u32 4294901760, %v137_v12  ;;  %v1895_v42 = vand.u32 4294901760, %v576_v36  ;;  %s1587_s1 = sshll.u32 %s1860_s0, 4  ;;  %s1588_s1 = int_to_ptr.vmem [resolvable:$true] %s1587_s1 }
  0x23   :  { %v189_v16 = vand.u32 4294901760, %v188_v13  ;;  %v148_v17 = vand.u32 4294901760, %v147_v14  ;;  %1667 = vmatprep.subr.mxu0 %v188_v13  ;;  %51 = vperm.xlu0 %1779, %v41_v11   ;;  %v1887_v28 = vsub.f32 %v573_v26, %v1884_v27  ;;  %s1827_s21 = scalar_lea.vmem %s1588_s1, 32  ;;  %p1832_p11 = scmp.lt.s32.totalorder %s1588_s1, %s1588_s1 }
  0x24   :  { %v139_v19 = vsub.f32 %v137_v12, %v138_v15  ;;  %v659_v51 = vsub.f32 %v576_v36, %v1895_v42  ;;  %p1828_p10 = scmp.ne.s32.totalorder %s1588_s1, %s1827_s21  ;;  %p1833_p12 = scmp.lt.s32.totalorder %s1827_s21, %s1827_s21 }
  0x25   :  { %v190_v20 = vsub.f32 %v188_v13, %v189_v16  ;;  %v149_v21 = vsub.f32 %v147_v14, %v148_v17  ;;  %v650_v29 = vand.u32 4294901760, %v1887_v28  ;;  %563 = vperm.xlu1 %1780, %v45_v33  }
  0x26   :  { %v140_v22 = vand.u32 4294901760, %v139_v19  ;;  %v660_v60 = vand.u32 4294901760, %v659_v51  ;;  %p1834_p13 = por %p1833_p12, %p1832_p11 }
  0x27   :  { %v191_v23 = vand.u32 4294901760, %v190_v20  ;;  %v150_v24 = vand.u32 4294901760, %v149_v21  ;;  %1087 = vperm.xlu0 %1779, %v48_v18   ;;  %v651_v30 = vsub.f32 %v1887_v28, %v650_v29  ;;  %v47_v20 = vld [vmem:[#allocation2 + $0x40] sm:$0x3] }
  0x28   :  { %1659 = vmatprep.mubr.f32.mxu0 %v140_v22  ;;  %v661_v2 = vsub.f32 %v659_v51, %v660_v60  ;;  %p1835_p0 = pnand %p1834_p13, %p1828_p10 }
  0x29   :  { %1662 = vmatprep.subr.mxu1 %v191_v23  ;;  %1660 = vmatmul.mubr.f32.vlgmr.msra.gmra.mxu0 %v150_v24  ;;  %v652_v31 = vand.u32 4294901760, %v651_v30 }
  0x2a   :  { %1663 = vmatpush3.msra.mxu1 %v191_v23  ;;  %1668 = vmatpush3.msra.mxu0 %v188_v13  ;;  %v1091_v23 = vsel %vm571_vm2, %v47_v20, 0 }
  0x2b   :  { %1665 = vmatmul.mubr.f32.vlgmr.msra.gmra.mxu1 %v146_v10  ;;  %1672 = vmatprep.subr.mxu1 %v101_v8  ;;  %v1914_v26 = vand.u32 4294901760, %v1091_v23 }
  0x2c   :  { %1669 = vmatprep.mubr.f32.mxu0 %v137_v12  ;;  %1673 = vmatpush3.msra.mxu1 %v101_v8 }
  0x2d   :  { %1674 = vmatprep.mubr.f32.mxu1 %v138_v15  ;;  %1670 = vmatmul.mubr.f32.vlgmr.msra.gmra.mxu0 %v147_v14  ;;  %v1164_v33 = vsub.f32 %v1091_v23, %v1914_v26 }
  0x2e   :  { %1677 = vmatprep.subr.mxu0 %v189_v16  ;;  %1682 = vmatprep.subr.mxu1 %v101_v8 }
  0x2f   :  { %1675 = vmatmul.mubr.f32.vlgmr.msra.gmra.mxu1 %v148_v17  ;;  %1678 = vmatpush3.msra.mxu0 %v189_v16  ;;  %v1858_v16 = vmov 0.0  }
  0x30   :  { %1679 = vmatprep.mubr.f32.mxu0 %v136_v9  ;;  %1683 = vmatpush3.msra.mxu1 %v101_v8  ;;  %v662_v8 = vand.u32 4294901760, %v661_v2 }
  0x31   :  { %1684 = vmatprep.mubr.f32.mxu1 %v136_v9  ;;  %1680 = vmatmul.mubr.f32.vlgmr.msra.gmra.mxu0 %v146_v10 }
  0x32   :  { %1691 = vmatprep.mubr.f32.mxu0 %v652_v31 }
  0x33   :  { %1685 = vmatmul.mubr.f32.vlgmr.msra.gmra.mxu1 %v146_v10 }
  0x34   :  { %1698 = vmatprep.mubr.f32.mxu1 %v1884_v27 }
  0x9a   :  { %v57_v34 = vpop.permute.xlu0 %56 }
  0x9c   :  { %v569_v17 = vpop.permute.xlu1 %568 }
  0x9e   :  { %v52_v40 = vpop.permute.xlu0 %51 }
  0xa0   :  { %v564_v24 = vpop.permute.xlu1 %563 }
  0xa2   :  { %v1088_v2 = vpop.permute.xlu0 %1087 }
  0xe9   :  { %v1661_v37 = vpop.f32.mrf.mxu0 }
  0xea   :  { %v153_v38 = vadd.f32 %v1661_v37, %v57_v34 }
  0xeb   :  { %v1666_v39 = vpop.f32.mrf.mxu1  ;;  %v142_v41 = vpop.f32.mrf.mxu0 }
  0xec   :  { %v235_v43 = vadd.f32 %v1666_v39, %v153_v38  ;;  %v143_v44 = vadd.f32 %v142_v41, %v52_v40  ;;  %v1165_v41 = vand.u32 4294901760, %v1164_v33 }
  0xed   :  { %v228_v45 = vpop.f32.mrf.mxu1  ;;  %v1671_v46 = vpop.f32.mrf.mxu0 }
  0xee   :  { %v229_v47 = vadd.f32 %v228_v45, %v143_v44  ;;  %v316_v48 = vadd.f32 %v1671_v46, %v235_v43 }
  0xef   :  { %v1676_v49 = vpop.f32.mrf.mxu1  ;;  %v308_v50 = vpop.f32.mrf.mxu0 }
  0xf0   :  { %v398_v52 = vadd.f32 %v1676_v49, %v316_v48  ;;  %v309_v53 = vadd.f32 %v308_v50, %v229_v47  ;;  %v1166_v49 = vsub.f32 %v1164_v33, %v1165_v41 }
  0xf1   :  { %v389_v54 = vpop.f32.mrf.mxu1  ;;  %v1681_v55 = vpop.f32.mrf.mxu0 }
  0xf2   :  { %v390_v56 = vadd.f32 %v389_v54, %v309_v53  ;;  %v478_v57 = vadd.f32 %v1681_v55, %v398_v52  ;;  %v1167_v54 = vand.u32 4294901760, %v1166_v49 }
  0xf3   :  { %v1686_v58 = vpop.f32.mrf.mxu1  ;;  %v471_v59 = vpop.f32.mrf.mxu0 }
  0xf4   :  { %v556_v61 = vadd.f32 %v1686_v58, %v478_v57  ;;  %v472_v62 = vadd.f32 %v471_v59, %v390_v56 }
  0xf5   :  { %v549_v63 = vpop.f32.mrf.mxu1 }
  0xf6   :  { %v560_v0 = vmax.f32 %v556_v61, 0.0  ;;  %v550_v1 = vadd.f32 %v549_v63, %v472_v62 }
  0xf8   :  { %v579_v3 = vsel %vm66_vm0, %v560_v0, 0  ;;  %v559_v4 = vmax.f32 %v550_v1, 0.0 }
  0xf9   :  { %v610_v5 = vand.u32 4294901760, %v579_v3 }
  0xfa   :  { %v613_v6 = vand.u32 4294901760, %v559_v4 }
  0xfb   :  { %v698_v7 = vsub.f32 %v579_v3, %v610_v5  ;;  %1687 = vmatprep.subr.mxu0 %v610_v5 }
  0xfc   :  { %v705_v9 = vsub.f32 %v559_v4, %v613_v6  ;;  %1688 = vmatpush3.msra.mxu0 %v610_v5 }
  0xfd   :  { %1689 = vmatprep.subr.mxu0 %v613_v6  ;;  %v699_v10 = vand.u32 4294901760, %v698_v7 }
  0xfe   :  { %1690 = vmatpush3.msra.mxu0 %v613_v6  ;;  %v706_v11 = vand.u32 4294901760, %v705_v9 }
  0xff   :  { %1701 = vmatprep.subr.mxu0 %v698_v7  ;;  %1692 = vmatmul.mubr.f32.vlgmr.msra.gmra.mxu0 %v662_v8  ;;  %v700_v12 = vsub.f32 %v698_v7, %v699_v10 }
 0x100   :  { %1702 = vmatpush3.msra.mxu0 %v698_v7  ;;  %1705 = vmatprep.mubr.f32.mxu0 %v1887_v28  ;;  %v707_v13 = vsub.f32 %v705_v9, %v706_v11 }
 0x101   :  { %1703 = vmatprep.subr.mxu0 %v705_v9  ;;  %v701_v14 = vand.u32 4294901760, %v700_v12 }
 0x102   :  { %1704 = vmatpush3.msra.mxu0 %v705_v9  ;;  %v708_v15 = vand.u32 4294901760, %v707_v13 }
 0x103   :  { %1694 = vmatprep.subr.mxu1 %v701_v14  ;;  %1715 = vmatprep.subr.mxu0 %v699_v10 }
 0x104   :  { %1695 = vmatpush3.msra.mxu1 %v701_v14  ;;  %1706 = vmatmul.mubr.f32.vlgmr.msra.gmra.mxu0 %v659_v51 }
 0x105   :  { %1716 = vmatpush3.msra.mxu0 %v699_v10  ;;  %1696 = vmatprep.subr.mxu1 %v708_v15 }
 0x106   :  { %1717 = vmatprep.subr.mxu0 %v706_v11  ;;  %1697 = vmatpush3.msra.mxu1 %v708_v15 }
 0x107   :  { %1718 = vmatpush3.msra.mxu0 %v706_v11  ;;  %1699 = vmatmul.mubr.f32.vlgmr.msra.gmra.mxu1 %v1895_v42 }
 0x108   :  { %1708 = vmatprep.subr.mxu1 %v610_v5  ;;  %1712 = vmatprep.mubr.f32.mxu1 %v650_v29 }
 0x109   :  { %1709 = vmatpush3.msra.mxu1 %v610_v5  ;;  %1719 = vmatprep.mubr.f32.mxu0 %v1884_v27 }
 0x10a   :  { %1710 = vmatprep.subr.mxu1 %v613_v6  ;;  %1720 = vmatmul.mubr.f32.vlgmr.msra.gmra.mxu0 %v1895_v42 }
 0x10b   :  { %1711 = vmatpush3.msra.mxu1 %v613_v6  ;;  %1729 = vmatprep.subr.mxu0 %v1858_v16 }
 0x10c   :  { %1713 = vmatmul.mubr.f32.vlgmr.msra.gmra.mxu1 %v660_v60  ;;  %1722 = vmatprep.subr.mxu1 %v610_v5 }
 0x10d   :  { %1723 = vmatpush3.msra.mxu1 %v610_v5  ;;  %1726 = vmatprep.mubr.f32.mxu1 %v1884_v27 }
 0x10e   :  { %1724 = vmatprep.subr.mxu1 %v613_v6  ;;  %1733 = vmatprep.mubr.msk.f32.mxu0 %vm1859_vm3, %v1858_v16 }
 0x10f   :  { %1725 = vmatpush3.msra.mxu1 %v613_v6 }
 0x110   :  { %1727 = vmatmul.mubr.f32.vlgmr.msra.gmra.mxu1 %v1895_v42  ;;  %1736 = vmatprep.subr.mxu1 %v1858_v16 }
 0x111   :  { %1740 = vmatprep.mubr.msk.f32.mxu1 %vm1859_vm3, %v1858_v16 }
 0x1bf   :  { %v1693_v18 = vpop.f32.mrf.mxu0 }
 0x1c0   :  { %v665_v21 = vadd.f32 %v1693_v18, %v569_v17 }
 0x1c1   :  { %v654_v19 = vpop.f32.mrf.mxu0 }
 0x1c2   :  { %v655_v27 = vadd.f32 %v654_v19, %v564_v24 }
 0x1c4   :  { %v1707_v22 = vpop.f32.mrf.mxu0 }
 0x1c6   :  { %v827_v29 = vpop.f32.mrf.mxu0 }
 0x1c7   :  { %v1700_v25 = vpop.f32.mrf.mxu1 }
 0x1c8   :  { %v752_v28 = vadd.f32 %v1700_v25, %v665_v21 }
 0x1c9   :  { %v745_v30 = vpop.f32.mrf.mxu1 }
 0x1ca   :  { %v835_v31 = vadd.f32 %v1707_v22, %v752_v28  ;;  %v746_v32 = vadd.f32 %v745_v30, %v655_v27  ;;  %v1721_v36 = vpop.f32.mrf.mxu0 }
 0x1cc   :  { %v828_v34 = vadd.f32 %v827_v29, %v746_v32  ;;  %v1714_v35 = vpop.f32.mrf.mxu1  ;;  %v994_v42 = vpop.f32.mrf.mxu0  ;;  %v1575_v29 = vlaneseq }
 0x1cd   :  { %v918_v37 = vadd.f32 %v1714_v35, %v835_v31 }
 0x1ce   :  { %v909_v38 = vpop.f32.mrf.mxu1  ;;  %v1576_v30 = vshrl.u32 %v1575_v29, 7 }
 0x1cf   :  { %v1001_v39 = vadd.f32 %v1721_v36, %v918_v37  ;;  %v910_v40 = vadd.f32 %v909_v38, %v828_v34 }
 0x1d0   :  { %v1728_v43 = vpop.f32.mrf.mxu1 }
 0x1d1   :  { %v995_v44 = vadd.f32 %v994_v42, %v910_v40  ;;  %v1080_v45 = vadd.f32 %v1728_v43, %v1001_v39 }
 0x1d2   :  { %v1073_v46 = vpop.f32.mrf.mxu1 }
 0x1d3   :  { %v1084_v47 = vmax.f32 %v1080_v45, 0.0  ;;  %v1074_v48 = vadd.f32 %v1073_v46, %v995_v44 }
 0x1d5   :  { %v1094_v50 = vsel %vm66_vm0, %v1084_v47, 0  ;;  %v1083_v51 = vmax.f32 %v1074_v48, 0.0 }
 0x1d6   :  { %v1125_v52 = vand.u32 4294901760, %v1094_v50 }
 0x1d7   :  { %v1128_v53 = vand.u32 4294901760, %v1083_v51 }
 0x1d8   :  { %v1203_v55 = vsub.f32 %v1094_v50, %v1125_v52  ;;  %1730 = vmatpush3.msra.mxu0 %v1125_v52 }
 0x1d9   :  { %v1210_v56 = vsub.f32 %v1083_v51, %v1128_v53  ;;  %1731 = vmatprep.subr.mxu0 %v1858_v16 }
 0x1da   :  { %v1204_v57 = vand.u32 4294901760, %v1203_v55  ;;  %1732 = vmatpush3.msra.mxu0 %v1128_v53 }
 0x1db   :  { %v1211_v58 = vand.u32 4294901760, %v1210_v56  ;;  %1734 = vmatmul.mubr.f32.vlgmr.msra.gmra.mxu0 %v1167_v54  ;;  %1743 = vmatprep.subr.mxu0 %v1858_v16 }
 0x1dc   :  { %1744 = vmatpush3.msra.mxu0 %v1203_v55  ;;  %1747 = vmatprep.mubr.msk.f32.mxu0 %vm1859_vm3, %v1858_v16  ;;  %v1205_v59 = vsub.f32 %v1203_v55, %v1204_v57 }
 0x1dd   :  { %v1212_v60 = vsub.f32 %v1210_v56, %v1211_v58  ;;  %1745 = vmatprep.subr.mxu0 %v1858_v16 }
 0x1de   :  { %1746 = vmatpush3.msra.mxu0 %v1210_v56  ;;  %v1206_v61 = vand.u32 4294901760, %v1205_v59 }
 0x1df   :  { %1757 = vmatprep.subr.mxu0 %v1858_v16  ;;  %1748 = vmatmul.mubr.f32.vlgmr.msra.gmra.mxu0 %v1164_v33  ;;  %v1213_v62 = vand.u32 4294901760, %v1212_v60  ;;  %v1577_v33 = vsub.s32 0, %v1576_v30 }
 0x1e0   :  { %1737 = vmatpush3.msra.mxu1 %v1206_v61  ;;  %1758 = vmatpush3.msra.mxu0 %v1204_v57 }
 0x1e1   :  { %1738 = vmatprep.subr.mxu1 %v1858_v16  ;;  %1759 = vmatprep.subr.mxu0 %v1858_v16 }
 0x1e2   :  { %1739 = vmatpush3.msra.mxu1 %v1213_v62  ;;  %1760 = vmatpush3.msra.mxu0 %v1211_v58 }
 0x1e3   :  { %1741 = vmatmul.mubr.f32.vlgmr.msra.gmra.mxu1 %v1914_v26  ;;  %1750 = vmatprep.subr.mxu1 %v1858_v16 }
 0x1e4   :  { %1751 = vmatpush3.msra.mxu1 %v1125_v52  ;;  %1754 = vmatprep.mubr.msk.f32.mxu1 %vm1859_vm3, %v1858_v16 }
 0x1e5   :  { %1752 = vmatprep.subr.mxu1 %v1858_v16  ;;  %1761 = vmatprep.mubr.msk.f32.mxu0 %vm1859_vm3, %v1858_v16 }
 0x1e6   :  { %1753 = vmatpush3.msra.mxu1 %v1128_v53  ;;  %1762 = vmatmul.mubr.f32.vlgmr.msra.gmra.mxu0 %v1914_v26 }
 0x1e7   :  { %1755 = vmatmul.mubr.f32.vlgmr.msra.gmra.mxu1 %v1165_v41  ;;  %1764 = vmatprep.subr.mxu1 %v1858_v16 }
 0x1e8   :  { %1765 = vmatpush3.msra.mxu1 %v1125_v52  ;;  %1768 = vmatprep.mubr.msk.f32.mxu1 %vm1859_vm3, %v1858_v16 }
 0x1e9   :  { %1766 = vmatprep.subr.mxu1 %v1858_v16 }
 0x1ea   :  { %1767 = vmatpush3.msra.mxu1 %v1128_v53 }
 0x1eb   :  { %1769 = vmatmul.mubr.f32.vlgmr.msra.gmra.mxu1 %v1914_v26 }
 0x29b   :  { %v1169_v63 = vpop.f32.mrf.mxu0 }
 0x29c   :  { %v1170_v4 = vadd.f32 %v1169_v63, %v1088_v2 }
 0x29d   :  { %v1735_v0 = vpop.f32.mrf.mxu0 }
 0x29f   :  { %v1326_v1 = vpop.f32.mrf.mxu0 }
 0x2a1   :  { %v1749_v3 = vpop.f32.mrf.mxu0 }
 0x2a3   :  { %v1250_v5 = vpop.f32.mrf.mxu1 }
 0x2a4   :  { %v1251_v6 = vadd.f32 %v1250_v5, %v1170_v4 }
 0x2a5   :  { %v1742_v7 = vpop.f32.mrf.mxu1 }
 0x2a6   :  { %v1327_v8 = vadd.f32 %v1326_v1, %v1251_v6  ;;  %v1478_v9 = vpop.f32.mrf.mxu0 }
 0x2a7   :  { %v1401_v10 = vpop.f32.mrf.mxu1 }
 0x2a8   :  { %v1402_v11 = vadd.f32 %v1401_v10, %v1327_v8  ;;  %v1763_v12 = vpop.f32.mrf.mxu0 }
 0x2a9   :  { %v1756_v13 = vpop.f32.mrf.mxu1 }
 0x2aa   :  { %v1479_v14 = vadd.f32 %v1478_v9, %v1402_v11 }
 0x2ab   :  { %v1551_v15 = vpop.f32.mrf.mxu1 }
 0x2ac   :  { %v1552_v16 = vadd.f32 %v1551_v15, %v1479_v14 }
 0x2ad   :  { %v1770_v17 = vpop.f32.mrf.mxu1 }
 0x2ae   :  { %v1556_v18 = vrot.slane %v1552_v16, 1 }
 0x2b0   :  { %v1558_v19 = vmax.f32 %v1552_v16, %v1556_v18 }
 0x2b2   :  { %v1559_v20 = vsub.f32 %v1552_v16, %v1558_v19  ;;  %v1563_v21 = vrot.slane %v1558_v19, 7 }
 0x2b4   :  { %v1565_v22 = vsub.f32 %v1552_v16, %v1563_v21  ;;  %v1560_v23 = vmul.f32 1.442695, %v1559_v20 }
 0x2b6   :  { %v1566_v24 = vmul.f32 1.442695, %v1565_v22 }
 0x2b8   :  { %1781 = vpow2.f32 %v1566_v24 }
 0x2b9   :  { %1783 = vpow2.f32 %v1560_v23 }
 0x2c5   :  { %v1782_v25 = vpop.eup %1781 }
 0x2c6   :  { %v1569_v26 = vrot.slane %v1782_v25, 1  ;;  %v1784_v27 = vpop.eup %1783 }
 0x2c8   :  { %v1571_v28 = vadd.f32 %v1784_v27, %v1569_v26 }
 0x2ca   :  { %1785 = vlog2.f32 %v1571_v28 }
 0x2d7   :  { %v1786_v31 = vpop.eup %1785 }
 0x2d8   :  { %v1573_v32 = vmul.f32 0.6931472, %v1786_v31 }
 0x2da   :  { %v1574_v34 = vadd.f32 %v1573_v32, %v1558_v19 }
 0x2dc   :  { %v1578_v35 = vrot.slane %v1574_v34, %v1577_v33 }
 0x2de   :  { %v1579_v36 = vsub.f32 %v1552_v16, %v1578_v35 }
 0x2e0   :  { %1580 = vst [vmem:[#allocation7] sm:$0x3] %v1579_v36 }
 0x2e1   :  { %1838 = shalt.err (!%p1835_p0)
}
 0x2e2   :  { %1590 = dma.vmem_to_hbm [thread:$0]  %s1588_s1, 32, %s1944_s2, [#allocation4]  }
 0x2e3   :  { %1851 = dma.done.wait [#allocation4], 32  }
 0x2e4   :  { %1852 = vsyncadd [#allocation4], 4294967264 }
 0x2e5   :  { %1594 = vsyncpa [#allocation3], 1 }
 0x2e6   :  { %1595 = vsyncpa [#allocation6], 1 }
 0x2e7   :  { %1596 = vsyncpa [#allocation4], 1 }

</bundles_post_ra>
